<compile_context>
chip_gen: v7x
topology: tpu7x:2x2x1
jax: 0.10.0
libtpu: 0.0.40
codegen_flags: <defaults>
</compile_context>

<pallas_src>
import functools

import jax
import jax.numpy as jnp
from jax.experimental import pallas as pl
from jax.experimental.pallas import tpu as pltpu


def _conv3x3_kernel(x_ref, w_ref, b_ref, o_ref, *, H, W, Cin, Cout, Nb):
    """3x3 / stride-1 / pad-1 conv for a block of Nb images (NC(HW) layout).

    x_ref: (Nb, Cin, H*W)   input images, spatial axis flattened onto lanes (model dtype)
    w_ref: (9, Cout, Cin)   weight, tap-major (t = kh*3 + kw)          (model dtype)
    b_ref: (Cout, 1)        bias (f32)
    o_ref: (Nb, Cout, H*W)  output (NCHW emitted directly, lane-dense stores)
    """
    HW = H * W

    # ---- Hoisted mask construction: built once per grid step, shared by all taps/images.
    # Flat lane index l = h*W + w; h-conditions are comparisons on l, w-conditions need
    # w = l mod W (a bitwise-and when W is a power of two).
    lane = jax.lax.broadcasted_iota(jnp.int32, (1, HW), 1)
    if (W & (W - 1)) == 0:
        w_idx = jnp.bitwise_and(lane, W - 1)
    else:
        w_idx = lane % W
    top_ok = lane >= W                      # h - 1 >= 0
    bot_ok = lane < (H - 1) * W             # h + 1 <= H - 1
    left_ok = w_idx >= 1                    # w - 1 >= 0
    right_ok = w_idx < (W - 1)              # w + 1 <= W - 1

    tap_masks = []
    for kh in range(3):
        for kw in range(3):
            conds = []
            if kh == 0:
                conds.append(top_ok)
            if kh == 2:
                conds.append(bot_ok)
            if kw == 0:
                conds.append(left_ok)
            if kw == 2:
                conds.append(right_ok)
            m = None
            for c in conds:
                m = c if m is None else jnp.logical_and(m, c)
            tap_masks.append(m)             # None for the center tap

    bias = b_ref[...]                       # (Cout, 1) f32, broadcasts over lanes

    # ---- 9 accumulated matmuls per image; no im2col scratch is ever written.
    for n in range(Nb):                     # static unroll over images in this block
        x_n = x_ref[n]                      # (Cin, HW), kept in the model dtype
        acc = None
        for kh in range(3):
            for kw in range(3):
                t = kh * 3 + kw
                s = (kh - 1) * W + (kw - 1)                 # lane offset of this tap
                if s == 0:
                    tap = x_n
                else:
                    # tap[:, l] = x[:, (l + s) mod HW]; wrap-around positions are exactly
                    # the implicit zero padding and get masked below (XLU vrot slot).
                    tap = pltpu.roll(x_n, (-s) % HW, axis=1)
                m = tap_masks[t]
                if m is not None:
                    tap = jnp.where(m, tap, jnp.zeros_like(tap))
                # (Cout, Cin) @ (Cin, HW) on the MXU, f32 accumulation only.
                p = jnp.dot(w_ref[t], tap, preferred_element_type=jnp.float32)
                acc = p if acc is None else acc + p
        o_ref[n] = (acc + bias).astype(o_ref.dtype)         # lane-dense unmasked stores


def _pick_batch_block(N, Cin, Cout, HW, itemsize):
    """Images per grid step: fill >= ~1024 lanes of spatial work, bounded by a VMEM budget."""
    per_image = HW * (Cin + Cout) * max(itemsize, 4)
    mem_cap = max(1, (8 << 20) // max(per_image, 1))        # keep 2x-buffered blocks modest
    lane_fill = max(1, pl.cdiv(1024, HW))
    nb = max(1, min(N, mem_cap, lane_fill))
    while N % nb:                                           # keep the grid exact
        nb -= 1
    return nb


def _vmem_limit_bytes(Nb, Cin, Cout, HW, itemsize):
    """Explicit scoped-VMEM budget (default is 16/32 MiB on v5e / v6e+).

    Clamped to 64 MiB so it is always safe on v7x; on v5e/v6e the physical 128 MiB allows
    larger blocks at production channel counts (then also see the spatial-tiling TODO).
    """
    io = 2 * Nb * HW * (Cin + Cout) * itemsize              # double-buffered I/O blocks
    wb = 9 * Cout * Cin * itemsize + Cout * 4               # weight + bias
    work = HW * (Cin * itemsize + Cout * 4) * 4             # taps + f32 accumulator headroom
    need = io + wb + work
    return int(min(max(2 * need, 32 << 20), 64 << 20))


def zero_conv2d(x_nchw, weight, bias):
    """Conv2d(kernel=3, stride=1, padding=1) matching PyTorch nn.Conv2d semantics.

    x_nchw : (N, Cin, H, W)
    weight : (Cout, Cin, 3, 3)   (PyTorch OIHW layout)
    bias   : (Cout,)
    returns: (N, Cout, H, W)
    """
    N, Cin, H, W = x_nchw.shape
    Cout = weight.shape[0]
    HW = H * W
    itemsize = jnp.dtype(x_nchw.dtype).itemsize

    Nb = _pick_batch_block(N, Cin, Cout, HW, itemsize)

    # Free metadata reshape only — no HBM transpose or pad. Tiny weight/bias transforms:
    # weight becomes tap-major (9, Cout, Cin) so each tap slice is a clean leading-axis read.
    x_flat = x_nchw.reshape(N, Cin, HW)
    w2 = jnp.transpose(weight, (2, 3, 0, 1)).reshape(9, Cout, Cin).astype(x_nchw.dtype)
    b2 = bias.astype(jnp.float32).reshape(Cout, 1)

    kernel = functools.partial(_conv3x3_kernel, H=H, W=W, Cin=Cin, Cout=Cout, Nb=Nb)

    out_flat = pl.pallas_call(
        kernel,
        out_shape=jax.ShapeDtypeStruct((N, Cout, HW), x_nchw.dtype),
        grid_spec=pltpu.PrefetchScalarGridSpec(
            num_scalar_prefetch=0,
            grid=(N // Nb,),
            in_specs=[
                pl.BlockSpec((Nb, Cin, HW), lambda i: (i, 0, 0)),
                pl.BlockSpec((9, Cout, Cin), lambda i: (0, 0, 0)),
                pl.BlockSpec((Cout, 1), lambda i: (0, 0)),
            ],
            out_specs=pl.BlockSpec((Nb, Cout, HW), lambda i: (i, 0, 0)),
        ),
        compiler_params=pltpu.CompilerParams(
            dimension_semantics=("parallel",),
            vmem_limit_bytes=_vmem_limit_bytes(Nb, Cin, Cout, HW, itemsize),
        ),
    )(x_flat, w2, b2)

    # Free reshape back to NCHW (kernel already produced channel-major output).
    return out_flat.reshape(N, Cout, H, W)


if __name__ == "__main__":
    key = jax.random.PRNGKey(0)
    N, Cin, Cout, H, W = 2, 4, 4, 16, 16
    kx, kw_key, kb_key = jax.random.split(key, 3)
    x = jax.random.normal(kx, (N, Cin, H, W), dtype=jnp.float32)

    # 1) ZeroConv2d semantics: zero-initialized weight & bias -> identically-zero output.
    w0 = jnp.zeros((Cout, Cin, 3, 3), dtype=jnp.float32)
    b0 = jnp.zeros((Cout,), dtype=jnp.float32)
    out0 = jax.block_until_ready(zero_conv2d(x, w0, b0))
    assert out0.shape == (N, Cout, H, W)
    assert bool(jnp.all(out0 == 0.0))

    # 2) Non-zero weights: cross-check the roll/mask tap logic against XLA's conv.
    w1 = jax.random.normal(kw_key, (Cout, Cin, 3, 3), dtype=jnp.float32)
    b1 = jax.random.normal(kb_key, (Cout,), dtype=jnp.float32)
    out1 = jax.block_until_ready(zero_conv2d(x, w1, b1))
    ref = jax.lax.conv_general_dilated(
        x, w1, window_strides=(1, 1), padding=((1, 1), (1, 1)),
        dimension_numbers=("NCHW", "OIHW", "NCHW"),
    ) + b1.reshape(1, Cout, 1, 1)
    max_diff = float(jnp.max(jnp.abs(out1 - ref)))
    # Precision contract: f32 operands use the MXU's default (bf16-pass) precision; a shift
    # or mask bug would produce O(1) errors and fail this check decisively.
    assert bool(jnp.allclose(out1, ref, atol=5e-2, rtol=5e-2)), max_diff

    print("KERNEL_OK")
</pallas_src>

<mosaic_0001>
module attributes {stable_mosaic.version = 11 : i64} {
  func.func @_conv3x3_kernel(%arg0: i32, %arg1: memref<2x4x256xf32, #tpu.memory_space<vmem>>, %arg2: memref<9x4x4xf32, #tpu.memory_space<vmem>>, %arg3: memref<4x1xf32, #tpu.memory_space<vmem>>, %arg4: memref<2x4x256xf32, #tpu.memory_space<vmem>>) attributes {dimension_semantics = [#tpu.dimension_semantics<parallel>], iteration_bounds = array<i64: 1>, scalar_prefetch = 0 : i64, scratch_operands = 0 : i64, tpu.core_type = #tpu.core_type<tc>, window_params = [{transform_indices = @transform_0, window_bounds = array<i64: 2, 4, 256>}, {pipeline_mode = #tpu.pipeline_mode<synchronous>, transform_indices = @transform_1, window_bounds = array<i64: 9, 4, 4>}, {pipeline_mode = #tpu.pipeline_mode<synchronous>, transform_indices = @transform_2, window_bounds = array<i64: 4, 1>}, {transform_indices = @transform_3, window_bounds = array<i64: 2, 4, 256>}]} {
    %0 = tpu.iota {dimensions = array<i32: 1>} : vector<1x256xi32>
    %c15_i32 = arith.constant 15 : i32
    %1 = vector.broadcast %c15_i32 : i32 to vector<1x256xi32>
    %2 = arith.andi %0, %1 : vector<1x256xi32>
    %c16_i32 = arith.constant 16 : i32
    %3 = vector.broadcast %c16_i32 : i32 to vector<1x256xi32>
    %4 = arith.cmpi sge, %0, %3 : vector<1x256xi32>
    %c240_i32 = arith.constant 240 : i32
    %5 = vector.broadcast %c240_i32 : i32 to vector<1x256xi32>
    %6 = arith.cmpi slt, %0, %5 : vector<1x256xi32>
    %c1_i32 = arith.constant 1 : i32
    %7 = vector.broadcast %c1_i32 : i32 to vector<1x256xi32>
    %8 = arith.cmpi sge, %2, %7 : vector<1x256xi32>
    %c15_i32_0 = arith.constant 15 : i32
    %9 = vector.broadcast %c15_i32_0 : i32 to vector<1x256xi32>
    %10 = arith.cmpi slt, %2, %9 : vector<1x256xi32>
    %11 = arith.andi %4, %8 : vector<1x256xi1>
    %12 = arith.andi %4, %10 : vector<1x256xi1>
    %13 = arith.andi %6, %8 : vector<1x256xi1>
    %14 = arith.andi %6, %10 : vector<1x256xi1>
    %c0 = arith.constant 0 : index
    %c0_1 = arith.constant 0 : index
    %15 = vector.load %arg3[%c0, %c0_1] : memref<4x1xf32, #tpu.memory_space<vmem>>, vector<4x1xf32>
    %c0_2 = arith.constant 0 : index
    %c0_3 = arith.constant 0 : index
    %c0_4 = arith.constant 0 : index
    %16 = vector.load %arg1[%c0_2, %c0_3, %c0_4] : memref<2x4x256xf32, #tpu.memory_space<vmem>>, vector<1x4x256xf32>
    %17 = vector.shape_cast %16 : vector<1x4x256xf32> to vector<4x256xf32>
    %c17_i32 = arith.constant 17 : i32
    %18 = tpu.dynamic_rotate %17 by %c17_i32 dim 1 : vector<4x256xf32>, i32 -> vector<4x256xf32>
    %cst = arith.constant 0.000000e+00 : f32
    %19 = vector.broadcast %cst : f32 to vector<4x256xf32>
    %20 = vector.shape_cast %11 : vector<1x256xi1> to vector<1x256xi1>
    %21 = vector.broadcast %20 : vector<1x256xi1> to vector<4x256xi1>
    %22 = arith.select %21, %18, %19 : vector<4x256xi1>, vector<4x256xf32>
    %c0_5 = arith.constant 0 : index
    %c0_6 = arith.constant 0 : index
    %c0_7 = arith.constant 0 : index
    %23 = vector.load %arg2[%c0_5, %c0_6, %c0_7] : memref<9x4x4xf32, #tpu.memory_space<vmem>>, vector<1x4x4xf32>
    %24 = vector.shape_cast %23 : vector<1x4x4xf32> to vector<4x4xf32>
    %cst_8 = arith.constant dense<0.000000e+00> : vector<4x256xf32>
    %25 = tpu.matmul %24, %22, %cst_8 {dimension_numbers = #tpu.dot_dimension_numbers<[1], [0], [0], [1], [0, 0, 1, 1], [], []>} : vector<4x4xf32>, vector<4x256xf32>, vector<4x256xf32> -> vector<4x256xf32>
    %c16_i32_9 = arith.constant 16 : i32
    %26 = tpu.dynamic_rotate %17 by %c16_i32_9 dim 1 : vector<4x256xf32>, i32 -> vector<4x256xf32>
    %cst_10 = arith.constant 0.000000e+00 : f32
    %27 = vector.broadcast %cst_10 : f32 to vector<4x256xf32>
    %28 = vector.shape_cast %4 : vector<1x256xi1> to vector<1x256xi1>
    %29 = vector.broadcast %28 : vector<1x256xi1> to vector<4x256xi1>
    %30 = arith.select %29, %26, %27 : vector<4x256xi1>, vector<4x256xf32>
    %c1 = arith.constant 1 : index
    %c0_11 = arith.constant 0 : index
    %c0_12 = arith.constant 0 : index
    %31 = vector.load %arg2[%c1, %c0_11, %c0_12] : memref<9x4x4xf32, #tpu.memory_space<vmem>>, vector<1x4x4xf32>
    %32 = vector.shape_cast %31 : vector<1x4x4xf32> to vector<4x4xf32>
    %cst_13 = arith.constant dense<0.000000e+00> : vector<4x256xf32>
    %33 = tpu.matmul %32, %30, %cst_13 {dimension_numbers = #tpu.dot_dimension_numbers<[1], [0], [0], [1], [0, 0, 1, 1], [], []>} : vector<4x4xf32>, vector<4x256xf32>, vector<4x256xf32> -> vector<4x256xf32>
    %34 = arith.addf %25, %33 : vector<4x256xf32>
    %c15_i32_14 = arith.constant 15 : i32
    %35 = tpu.dynamic_rotate %17 by %c15_i32_14 dim 1 : vector<4x256xf32>, i32 -> vector<4x256xf32>
    %cst_15 = arith.constant 0.000000e+00 : f32
    %36 = vector.broadcast %cst_15 : f32 to vector<4x256xf32>
    %37 = vector.shape_cast %12 : vector<1x256xi1> to vector<1x256xi1>
    %38 = vector.broadcast %37 : vector<1x256xi1> to vector<4x256xi1>
    %39 = arith.select %38, %35, %36 : vector<4x256xi1>, vector<4x256xf32>
    %c2 = arith.constant 2 : index
    %c0_16 = arith.constant 0 : index
    %c0_17 = arith.constant 0 : index
    %40 = vector.load %arg2[%c2, %c0_16, %c0_17] : memref<9x4x4xf32, #tpu.memory_space<vmem>>, vector<1x4x4xf32>
    %41 = vector.shape_cast %40 : vector<1x4x4xf32> to vector<4x4xf32>
    %cst_18 = arith.constant dense<0.000000e+00> : vector<4x256xf32>
    %42 = tpu.matmul %41, %39, %cst_18 {dimension_numbers = #tpu.dot_dimension_numbers<[1], [0], [0], [1], [0, 0, 1, 1], [], []>} : vector<4x4xf32>, vector<4x256xf32>, vector<4x256xf32> -> vector<4x256xf32>
    %43 = arith.addf %34, %42 : vector<4x256xf32>
    %c1_i32_19 = arith.constant 1 : i32
    %44 = tpu.dynamic_rotate %17 by %c1_i32_19 dim 1 : vector<4x256xf32>, i32 -> vector<4x256xf32>
    %cst_20 = arith.constant 0.000000e+00 : f32
    %45 = vector.broadcast %cst_20 : f32 to vector<4x256xf32>
    %46 = vector.shape_cast %8 : vector<1x256xi1> to vector<1x256xi1>
    %47 = vector.broadcast %46 : vector<1x256xi1> to vector<4x256xi1>
    %48 = arith.select %47, %44, %45 : vector<4x256xi1>, vector<4x256xf32>
    %c3 = arith.constant 3 : index
    %c0_21 = arith.constant 0 : index
    %c0_22 = arith.constant 0 : index
    %49 = vector.load %arg2[%c3, %c0_21, %c0_22] : memref<9x4x4xf32, #tpu.memory_space<vmem>>, vector<1x4x4xf32>
    %50 = vector.shape_cast %49 : vector<1x4x4xf32> to vector<4x4xf32>
    %cst_23 = arith.constant dense<0.000000e+00> : vector<4x256xf32>
    %51 = tpu.matmul %50, %48, %cst_23 {dimension_numbers = #tpu.dot_dimension_numbers<[1], [0], [0], [1], [0, 0, 1, 1], [], []>} : vector<4x4xf32>, vector<4x256xf32>, vector<4x256xf32> -> vector<4x256xf32>
    %52 = arith.addf %43, %51 : vector<4x256xf32>
    %c4 = arith.constant 4 : index
    %c0_24 = arith.constant 0 : index
    %c0_25 = arith.constant 0 : index
    %53 = vector.load %arg2[%c4, %c0_24, %c0_25] : memref<9x4x4xf32, #tpu.memory_space<vmem>>, vector<1x4x4xf32>
    %54 = vector.shape_cast %53 : vector<1x4x4xf32> to vector<4x4xf32>
    %cst_26 = arith.constant dense<0.000000e+00> : vector<4x256xf32>
    %55 = tpu.matmul %54, %17, %cst_26 {dimension_numbers = #tpu.dot_dimension_numbers<[1], [0], [0], [1], [0, 0, 1, 1], [], []>} : vector<4x4xf32>, vector<4x256xf32>, vector<4x256xf32> -> vector<4x256xf32>
    %56 = arith.addf %52, %55 : vector<4x256xf32>
    %c255_i32 = arith.constant 255 : i32
    %57 = tpu.dynamic_rotate %17 by %c255_i32 dim 1 : vector<4x256xf32>, i32 -> vector<4x256xf32>
    %cst_27 = arith.constant 0.000000e+00 : f32
    %58 = vector.broadcast %cst_27 : f32 to vector<4x256xf32>
    %59 = vector.shape_cast %10 : vector<1x256xi1> to vector<1x256xi1>
    %60 = vector.broadcast %59 : vector<1x256xi1> to vector<4x256xi1>
    %61 = arith.select %60, %57, %58 : vector<4x256xi1>, vector<4x256xf32>
    %c5 = arith.constant 5 : index
    %c0_28 = arith.constant 0 : index
    %c0_29 = arith.constant 0 : index
    %62 = vector.load %arg2[%c5, %c0_28, %c0_29] : memref<9x4x4xf32, #tpu.memory_space<vmem>>, vector<1x4x4xf32>
    %63 = vector.shape_cast %62 : vector<1x4x4xf32> to vector<4x4xf32>
    %cst_30 = arith.constant dense<0.000000e+00> : vector<4x256xf32>
    %64 = tpu.matmul %63, %61, %cst_30 {dimension_numbers = #tpu.dot_dimension_numbers<[1], [0], [0], [1], [0, 0, 1, 1], [], []>} : vector<4x4xf32>, vector<4x256xf32>, vector<4x256xf32> -> vector<4x256xf32>
    %65 = arith.addf %56, %64 : vector<4x256xf32>
    %c241_i32 = arith.constant 241 : i32
    %66 = tpu.dynamic_rotate %17 by %c241_i32 dim 1 : vector<4x256xf32>, i32 -> vector<4x256xf32>
    %cst_31 = arith.constant 0.000000e+00 : f32
    %67 = vector.broadcast %cst_31 : f32 to vector<4x256xf32>
    %68 = vector.shape_cast %13 : vector<1x256xi1> to vector<1x256xi1>
    %69 = vector.broadcast %68 : vector<1x256xi1> to vector<4x256xi1>
    %70 = arith.select %69, %66, %67 : vector<4x256xi1>, vector<4x256xf32>
    %c6 = arith.constant 6 : index
    %c0_32 = arith.constant 0 : index
    %c0_33 = arith.constant 0 : index
    %71 = vector.load %arg2[%c6, %c0_32, %c0_33] : memref<9x4x4xf32, #tpu.memory_space<vmem>>, vector<1x4x4xf32>
    %72 = vector.shape_cast %71 : vector<1x4x4xf32> to vector<4x4xf32>
    %cst_34 = arith.constant dense<0.000000e+00> : vector<4x256xf32>
    %73 = tpu.matmul %72, %70, %cst_34 {dimension_numbers = #tpu.dot_dimension_numbers<[1], [0], [0], [1], [0, 0, 1, 1], [], []>} : vector<4x4xf32>, vector<4x256xf32>, vector<4x256xf32> -> vector<4x256xf32>
    %74 = arith.addf %65, %73 : vector<4x256xf32>
    %c240_i32_35 = arith.constant 240 : i32
    %75 = tpu.dynamic_rotate %17 by %c240_i32_35 dim 1 : vector<4x256xf32>, i32 -> vector<4x256xf32>
    %cst_36 = arith.constant 0.000000e+00 : f32
    %76 = vector.broadcast %cst_36 : f32 to vector<4x256xf32>
    %77 = vector.shape_cast %6 : vector<1x256xi1> to vector<1x256xi1>
    %78 = vector.broadcast %77 : vector<1x256xi1> to vector<4x256xi1>
    %79 = arith.select %78, %75, %76 : vector<4x256xi1>, vector<4x256xf32>
    %c7 = arith.constant 7 : index
    %c0_37 = arith.constant 0 : index
    %c0_38 = arith.constant 0 : index
    %80 = vector.load %arg2[%c7, %c0_37, %c0_38] : memref<9x4x4xf32, #tpu.memory_space<vmem>>, vector<1x4x4xf32>
    %81 = vector.shape_cast %80 : vector<1x4x4xf32> to vector<4x4xf32>
    %cst_39 = arith.constant dense<0.000000e+00> : vector<4x256xf32>
    %82 = tpu.matmul %81, %79, %cst_39 {dimension_numbers = #tpu.dot_dimension_numbers<[1], [0], [0], [1], [0, 0, 1, 1], [], []>} : vector<4x4xf32>, vector<4x256xf32>, vector<4x256xf32> -> vector<4x256xf32>
    %83 = arith.addf %74, %82 : vector<4x256xf32>
    %c239_i32 = arith.constant 239 : i32
    %84 = tpu.dynamic_rotate %17 by %c239_i32 dim 1 : vector<4x256xf32>, i32 -> vector<4x256xf32>
    %cst_40 = arith.constant 0.000000e+00 : f32
    %85 = vector.broadcast %cst_40 : f32 to vector<4x256xf32>
    %86 = vector.shape_cast %14 : vector<1x256xi1> to vector<1x256xi1>
    %87 = vector.broadcast %86 : vector<1x256xi1> to vector<4x256xi1>
    %88 = arith.select %87, %84, %85 : vector<4x256xi1>, vector<4x256xf32>
    %c8 = arith.constant 8 : index
    %c0_41 = arith.constant 0 : index
    %c0_42 = arith.constant 0 : index
    %89 = vector.load %arg2[%c8, %c0_41, %c0_42] : memref<9x4x4xf32, #tpu.memory_space<vmem>>, vector<1x4x4xf32>
    %90 = vector.shape_cast %89 : vector<1x4x4xf32> to vector<4x4xf32>
    %cst_43 = arith.constant dense<0.000000e+00> : vector<4x256xf32>
    %91 = tpu.matmul %90, %88, %cst_43 {dimension_numbers = #tpu.dot_dimension_numbers<[1], [0], [0], [1], [0, 0, 1, 1], [], []>} : vector<4x4xf32>, vector<4x256xf32>, vector<4x256xf32> -> vector<4x256xf32>
    %92 = arith.addf %83, %91 : vector<4x256xf32>
    %93 = vector.broadcast %15 : vector<4x1xf32> to vector<4x256xf32>
    %94 = arith.addf %92, %93 : vector<4x256xf32>
    %c0_44 = arith.constant 0 : index
    %c0_45 = arith.constant 0 : index
    %c0_46 = arith.constant 0 : index
    %95 = vector.load %arg4[%c0_44, %c0_45, %c0_46] : memref<2x4x256xf32, #tpu.memory_space<vmem>>, vector<1x4x256xf32>
    %96 = vector.shape_cast %95 : vector<1x4x256xf32> to vector<4x256xf32>
    %97 = vector.shape_cast %94 : vector<4x256xf32> to vector<1x4x256xf32>
    tpu.vector_store %arg4[%c0_44, %c0_45, %c0_46], %97 {strides = array<i32>} : memref<2x4x256xf32, #tpu.memory_space<vmem>>, vector<1x4x256xf32>,
    %c1_47 = arith.constant 1 : index
    %c0_48 = arith.constant 0 : index
    %c0_49 = arith.constant 0 : index
    %98 = vector.load %arg1[%c1_47, %c0_48, %c0_49] : memref<2x4x256xf32, #tpu.memory_space<vmem>>, vector<1x4x256xf32>
    %99 = vector.shape_cast %98 : vector<1x4x256xf32> to vector<4x256xf32>
    %c17_i32_50 = arith.constant 17 : i32
    %100 = tpu.dynamic_rotate %99 by %c17_i32_50 dim 1 : vector<4x256xf32>, i32 -> vector<4x256xf32>
    %cst_51 = arith.constant 0.000000e+00 : f32
    %101 = vector.broadcast %cst_51 : f32 to vector<4x256xf32>
    %102 = vector.shape_cast %11 : vector<1x256xi1> to vector<1x256xi1>
    %103 = vector.broadcast %102 : vector<1x256xi1> to vector<4x256xi1>
    %104 = arith.select %103, %100, %101 : vector<4x256xi1>, vector<4x256xf32>
    %c0_52 = arith.constant 0 : index
    %c0_53 = arith.constant 0 : index
    %c0_54 = arith.constant 0 : index
    %105 = vector.load %arg2[%c0_52, %c0_53, %c0_54] : memref<9x4x4xf32, #tpu.memory_space<vmem>>, vector<1x4x4xf32>
    %106 = vector.shape_cast %105 : vector<1x4x4xf32> to vector<4x4xf32>
    %cst_55 = arith.constant dense<0.000000e+00> : vector<4x256xf32>
    %107 = tpu.matmul %106, %104, %cst_55 {dimension_numbers = #tpu.dot_dimension_numbers<[1], [0], [0], [1], [0, 0, 1, 1], [], []>} : vector<4x4xf32>, vector<4x256xf32>, vector<4x256xf32> -> vector<4x256xf32>
    %c16_i32_56 = arith.constant 16 : i32
    %108 = tpu.dynamic_rotate %99 by %c16_i32_56 dim 1 : vector<4x256xf32>, i32 -> vector<4x256xf32>
    %cst_57 = arith.constant 0.000000e+00 : f32
    %109 = vector.broadcast %cst_57 : f32 to vector<4x256xf32>
    %110 = vector.shape_cast %4 : vector<1x256xi1> to vector<1x256xi1>
    %111 = vector.broadcast %110 : vector<1x256xi1> to vector<4x256xi1>
    %112 = arith.select %111, %108, %109 : vector<4x256xi1>, vector<4x256xf32>
    %c1_58 = arith.constant 1 : index
    %c0_59 = arith.constant 0 : index
    %c0_60 = arith.constant 0 : index
    %113 = vector.load %arg2[%c1_58, %c0_59, %c0_60] : memref<9x4x4xf32, #tpu.memory_space<vmem>>, vector<1x4x4xf32>
    %114 = vector.shape_cast %113 : vector<1x4x4xf32> to vector<4x4xf32>
    %cst_61 = arith.constant dense<0.000000e+00> : vector<4x256xf32>
    %115 = tpu.matmul %114, %112, %cst_61 {dimension_numbers = #tpu.dot_dimension_numbers<[1], [0], [0], [1], [0, 0, 1, 1], [], []>} : vector<4x4xf32>, vector<4x256xf32>, vector<4x256xf32> -> vector<4x256xf32>
    %116 = arith.addf %107, %115 : vector<4x256xf32>
    %c15_i32_62 = arith.constant 15 : i32
    %117 = tpu.dynamic_rotate %99 by %c15_i32_62 dim 1 : vector<4x256xf32>, i32 -> vector<4x256xf32>
    %cst_63 = arith.constant 0.000000e+00 : f32
    %118 = vector.broadcast %cst_63 : f32 to vector<4x256xf32>
    %119 = vector.shape_cast %12 : vector<1x256xi1> to vector<1x256xi1>
    %120 = vector.broadcast %119 : vector<1x256xi1> to vector<4x256xi1>
    %121 = arith.select %120, %117, %118 : vector<4x256xi1>, vector<4x256xf32>
    %c2_64 = arith.constant 2 : index
    %c0_65 = arith.constant 0 : index
    %c0_66 = arith.constant 0 : index
    %122 = vector.load %arg2[%c2_64, %c0_65, %c0_66] : memref<9x4x4xf32, #tpu.memory_space<vmem>>, vector<1x4x4xf32>
    %123 = vector.shape_cast %122 : vector<1x4x4xf32> to vector<4x4xf32>
    %cst_67 = arith.constant dense<0.000000e+00> : vector<4x256xf32>
    %124 = tpu.matmul %123, %121, %cst_67 {dimension_numbers = #tpu.dot_dimension_numbers<[1], [0], [0], [1], [0, 0, 1, 1], [], []>} : vector<4x4xf32>, vector<4x256xf32>, vector<4x256xf32> -> vector<4x256xf32>
    %125 = arith.addf %116, %124 : vector<4x256xf32>
    %c1_i32_68 = arith.constant 1 : i32
    %126 = tpu.dynamic_rotate %99 by %c1_i32_68 dim 1 : vector<4x256xf32>, i32 -> vector<4x256xf32>
    %cst_69 = arith.constant 0.000000e+00 : f32
    %127 = vector.broadcast %cst_69 : f32 to vector<4x256xf32>
    %128 = vector.shape_cast %8 : vector<1x256xi1> to vector<1x256xi1>
    %129 = vector.broadcast %128 : vector<1x256xi1> to vector<4x256xi1>
    %130 = arith.select %129, %126, %127 : vector<4x256xi1>, vector<4x256xf32>
    %c3_70 = arith.constant 3 : index
    %c0_71 = arith.constant 0 : index
    %c0_72 = arith.constant 0 : index
    %131 = vector.load %arg2[%c3_70, %c0_71, %c0_72] : memref<9x4x4xf32, #tpu.memory_space<vmem>>, vector<1x4x4xf32>
    %132 = vector.shape_cast %131 : vector<1x4x4xf32> to vector<4x4xf32>
    %cst_73 = arith.constant dense<0.000000e+00> : vector<4x256xf32>
    %133 = tpu.matmul %132, %130, %cst_73 {dimension_numbers = #tpu.dot_dimension_numbers<[1], [0], [0], [1], [0, 0, 1, 1], [], []>} : vector<4x4xf32>, vector<4x256xf32>, vector<4x256xf32> -> vector<4x256xf32>
    %134 = arith.addf %125, %133 : vector<4x256xf32>
    %c4_74 = arith.constant 4 : index
    %c0_75 = arith.constant 0 : index
    %c0_76 = arith.constant 0 : index
    %135 = vector.load %arg2[%c4_74, %c0_75, %c0_76] : memref<9x4x4xf32, #tpu.memory_space<vmem>>, vector<1x4x4xf32>
    %136 = vector.shape_cast %135 : vector<1x4x4xf32> to vector<4x4xf32>
    %cst_77 = arith.constant dense<0.000000e+00> : vector<4x256xf32>
    %137 = tpu.matmul %136, %99, %cst_77 {dimension_numbers = #tpu.dot_dimension_numbers<[1], [0], [0], [1], [0, 0, 1, 1], [], []>} : vector<4x4xf32>, vector<4x256xf32>, vector<4x256xf32> -> vector<4x256xf32>
    %138 = arith.addf %134, %137 : vector<4x256xf32>
    %c255_i32_78 = arith.constant 255 : i32
    %139 = tpu.dynamic_rotate %99 by %c255_i32_78 dim 1 : vector<4x256xf32>, i32 -> vector<4x256xf32>
    %cst_79 = arith.constant 0.000000e+00 : f32
    %140 = vector.broadcast %cst_79 : f32 to vector<4x256xf32>
    %141 = vector.shape_cast %10 : vector<1x256xi1> to vector<1x256xi1>
    %142 = vector.broadcast %141 : vector<1x256xi1> to vector<4x256xi1>
    %143 = arith.select %142, %139, %140 : vector<4x256xi1>, vector<4x256xf32>
    %c5_80 = arith.constant 5 : index
    %c0_81 = arith.constant 0 : index
    %c0_82 = arith.constant 0 : index
    %144 = vector.load %arg2[%c5_80, %c0_81, %c0_82] : memref<9x4x4xf32, #tpu.memory_space<vmem>>, vector<1x4x4xf32>
    %145 = vector.shape_cast %144 : vector<1x4x4xf32> to vector<4x4xf32>
    %cst_83 = arith.constant dense<0.000000e+00> : vector<4x256xf32>
    %146 = tpu.matmul %145, %143, %cst_83 {dimension_numbers = #tpu.dot_dimension_numbers<[1], [0], [0], [1], [0, 0, 1, 1], [], []>} : vector<4x4xf32>, vector<4x256xf32>, vector<4x256xf32> -> vector<4x256xf32>
    %147 = arith.addf %138, %146 : vector<4x256xf32>
    %c241_i32_84 = arith.constant 241 : i32
    %148 = tpu.dynamic_rotate %99 by %c241_i32_84 dim 1 : vector<4x256xf32>, i32 -> vector<4x256xf32>
    %cst_85 = arith.constant 0.000000e+00 : f32
    %149 = vector.broadcast %cst_85 : f32 to vector<4x256xf32>
    %150 = vector.shape_cast %13 : vector<1x256xi1> to vector<1x256xi1>
    %151 = vector.broadcast %150 : vector<1x256xi1> to vector<4x256xi1>
    %152 = arith.select %151, %148, %149 : vector<4x256xi1>, vector<4x256xf32>
    %c6_86 = arith.constant 6 : index
    %c0_87 = arith.constant 0 : index
    %c0_88 = arith.constant 0 : index
    %153 = vector.load %arg2[%c6_86, %c0_87, %c0_88] : memref<9x4x4xf32, #tpu.memory_space<vmem>>, vector<1x4x4xf32>
    %154 = vector.shape_cast %153 : vector<1x4x4xf32> to vector<4x4xf32>
    %cst_89 = arith.constant dense<0.000000e+00> : vector<4x256xf32>
    %155 = tpu.matmul %154, %152, %cst_89 {dimension_numbers = #tpu.dot_dimension_numbers<[1], [0], [0], [1], [0, 0, 1, 1], [], []>} : vector<4x4xf32>, vector<4x256xf32>, vector<4x256xf32> -> vector<4x256xf32>
    %156 = arith.addf %147, %155 : vector<4x256xf32>
    %c240_i32_90 = arith.constant 240 : i32
    %157 = tpu.dynamic_rotate %99 by %c240_i32_90 dim 1 : vector<4x256xf32>, i32 -> vector<4x256xf32>
    %cst_91 = arith.constant 0.000000e+00 : f32
    %158 = vector.broadcast %cst_91 : f32 to vector<4x256xf32>
    %159 = vector.shape_cast %6 : vector<1x256xi1> to vector<1x256xi1>
    %160 = vector.broadcast %159 : vector<1x256xi1> to vector<4x256xi1>
    %161 = arith.select %160, %157, %158 : vector<4x256xi1>, vector<4x256xf32>
    %c7_92 = arith.constant 7 : index
    %c0_93 = arith.constant 0 : index
    %c0_94 = arith.constant 0 : index
    %162 = vector.load %arg2[%c7_92, %c0_93, %c0_94] : memref<9x4x4xf32, #tpu.memory_space<vmem>>, vector<1x4x4xf32>
    %163 = vector.shape_cast %162 : vector<1x4x4xf32> to vector<4x4xf32>
    %cst_95 = arith.constant dense<0.000000e+00> : vector<4x256xf32>
    %164 = tpu.matmul %163, %161, %cst_95 {dimension_numbers = #tpu.dot_dimension_numbers<[1], [0], [0], [1], [0, 0, 1, 1], [], []>} : vector<4x4xf32>, vector<4x256xf32>, vector<4x256xf32> -> vector<4x256xf32>
    %165 = arith.addf %156, %164 : vector<4x256xf32>
    %c239_i32_96 = arith.constant 239 : i32
    %166 = tpu.dynamic_rotate %99 by %c239_i32_96 dim 1 : vector<4x256xf32>, i32 -> vector<4x256xf32>
    %cst_97 = arith.constant 0.000000e+00 : f32
    %167 = vector.broadcast %cst_97 : f32 to vector<4x256xf32>
    %168 = vector.shape_cast %14 : vector<1x256xi1> to vector<1x256xi1>
    %169 = vector.broadcast %168 : vector<1x256xi1> to vector<4x256xi1>
    %170 = arith.select %169, %166, %167 : vector<4x256xi1>, vector<4x256xf32>
    %c8_98 = arith.constant 8 : index
    %c0_99 = arith.constant 0 : index
    %c0_100 = arith.constant 0 : index
    %171 = vector.load %arg2[%c8_98, %c0_99, %c0_100] : memref<9x4x4xf32, #tpu.memory_space<vmem>>, vector<1x4x4xf32>
    %172 = vector.shape_cast %171 : vector<1x4x4xf32> to vector<4x4xf32>
    %cst_101 = arith.constant dense<0.000000e+00> : vector<4x256xf32>
    %173 = tpu.matmul %172, %170, %cst_101 {dimension_numbers = #tpu.dot_dimension_numbers<[1], [0], [0], [1], [0, 0, 1, 1], [], []>} : vector<4x4xf32>, vector<4x256xf32>, vector<4x256xf32> -> vector<4x256xf32>
    %174 = arith.addf %165, %173 : vector<4x256xf32>
    %175 = vector.broadcast %15 : vector<4x1xf32> to vector<4x256xf32>
    %176 = arith.addf %174, %175 : vector<4x256xf32>
    %c1_102 = arith.constant 1 : index
    %c0_103 = arith.constant 0 : index
    %c0_104 = arith.constant 0 : index
    %177 = vector.load %arg4[%c1_102, %c0_103, %c0_104] : memref<2x4x256xf32, #tpu.memory_space<vmem>>, vector<1x4x256xf32>
    %178 = vector.shape_cast %177 : vector<1x4x256xf32> to vector<4x256xf32>
    %179 = vector.shape_cast %176 : vector<4x256xf32> to vector<1x4x256xf32>
    tpu.vector_store %arg4[%c1_102, %c0_103, %c0_104], %179 {strides = array<i32>} : memref<2x4x256xf32, #tpu.memory_space<vmem>>, vector<1x4x256xf32>,
    return
  }
  func.func @transform_0(%arg0: i32) -> (i32, i32, i32) {
    %c0_i32 = arith.constant 0 : i32
    %c0_i32_0 = arith.constant 0 : i32
    %c0_i32_1 = arith.constant 0 : i32
    return %arg0, %c0_i32, %c0_i32_0 : i32, i32, i32
  }
  func.func @transform_1(%arg0: i32) -> (i32, i32, i32) {
    %c0_i32 = arith.constant 0 : i32
    %c0_i32_0 = arith.constant 0 : i32
    %c0_i32_1 = arith.constant 0 : i32
    %c0_i32_2 = arith.constant 0 : i32
    return %c0_i32, %c0_i32_0, %c0_i32_1 : i32, i32, i32
  }
  func.func @transform_2(%arg0: i32) -> (i32, i32) {
    %c0_i32 = arith.constant 0 : i32
    %c0_i32_0 = arith.constant 0 : i32
    %c0_i32_1 = arith.constant 0 : i32
    return %c0_i32, %c0_i32_0 : i32, i32
  }
  func.func @transform_3(%arg0: i32) -> (i32, i32, i32) {
    %c0_i32 = arith.constant 0 : i32
    %c0_i32_0 = arith.constant 0 : i32
    %c0_i32_1 = arith.constant 0 : i32
    return %arg0, %c0_i32, %c0_i32_0 : i32, i32, i32
  }
}

</mosaic_0001>

<bundles_post_ra>
// kernel: tpu_custom_call.1
= control target key start
LH: loop header
LB: loop body
LE: loop exit
PB: predicated region body
PF: predicated region fallthrough
CT: control target
= control target key end

     0   :  { %s1885_s16 = smov 16   ;;  %v1886_v4 = vmov 0.0   ;;  %s2290_s0 = inlined_call_operand.vmem [shape: f32[2,4,256], index: 0, kind: input, shape index: {}]   ;;  %s2291_s1 = inlined_call_operand.vmem [shape: f32[9,4,4], index: 1, kind: input, shape index: {}]   ;;  %s2292_s2 = inlined_call_operand.vmem [shape: f32[4,1], index: 2, kind: input, shape index: {}]   ;;  %s2293_s3 = inlined_call_operand.hbm [shape: f32[2,4,256], index: 3, kind: output, shape index: {}]  }
   0x1   :  { %v1921_v0 = vld [vmem:[%s2290_s0 + $0x8] sm:$0xff]  ;;  %v1926_v1 = vld [vmem:[%s2290_s0] sm:$0xff]  ;;  %145 = vmatprep.mubr.f32.mxu0 %v1886_v4  ;;  %1004 = vmatprep.mubr.f32.mxu1 %v1886_v4 }
   0x2   :  { %922 = vrot.lane.b32.xlu1 %v1921_v0, %s1885_s16  ;;  %55 = vrot.lane.b32.xlu0 %v1926_v1, %s1885_s16  ;;  %v1932_v2 = vcombine.high %v1921_v0, %v1921_v0  ;;  %v1936_v3 = vcombine.high %v1926_v1, %v1926_v1 }
   0x3   :  { %8 = vsyncpa [#allocation3], 0  ;;  %s1887_s0 = smov 17   ;;  %s1888_s17 = smov 15   ;;  %v1894_v5 = vmov 0   ;;  %v15_v7 = vlaneseq  ;;  %vm74_vm1 = vcmask 1043456  }
   0x4   :  { %s1889_s18 = smov 1   ;;  %s1890_s19 = smov 127   ;;  %1858 = vset.pattern.permute.xlu0 %v1894_v5  ;;  %v36_v6 = vld [vmem:[%s2292_s2] sm:$0xf]  ;;  %vm70_vm4 = vcmask 31744  }
   0x5   :  { %s1891_s20 = smov 113   ;;  %s1892_s21 = smov 112   ;;  %v1973_v8 = vand.u32 127, %v15_v7  ;;  %v1742_v21 = vld [vmem:[%s2291_s1 + $0x4] sm:$0xf] }
   0x6   :  { %924 = vrot.lane.b32.xlu1 %v1932_v2, %s1885_s16  ;;  %57 = vrot.lane.b32.xlu0 %v1936_v3, %s1885_s16  ;;  %s1893_s22 = smov 111   ;;  %v1778_v22 = vld [vmem:[%s2291_s1 + $0x4] sm:$0xf]  ;;  %v54_v38 = vld [vmem:[%s2291_s1] sm:$0xf]  ;;  %s1895_s4 = smov [#allocation2]  }
   0x7   :  { %v1976_v9 = vadd.s32 128, %v1973_v8  ;;  %v18_v12 = vand.u32 15, %v1973_v8  ;;  %vm59_vm0 = vcmp.lt.s32.totalorder %v1973_v8, 16  ;;  %vm20_vm2 = vcmp.ge.s32.totalorder %v1973_v8, 16  ;;  %v921_v41 = vld [vmem:[%s2291_s1] sm:$0xf] }
   0x8   :  { %vm45_vm5 = vcmp.lt.s32.totalorder %v1973_v8, 17  ;;  %vm236_vm9 = vcmp.lt.s32.totalorder %v1973_v8, 15  ;;  %v1749_v54 = vld [vmem:[%s2291_s1 + $0x8] sm:$0xf]  ;;  %vm333_vm12 = vcmp.lt.s32.totalorder %v1973_v8, 1  ;;  %vm512_vm13 = vcmp.lt.s32.totalorder %v1973_v8, 127 }
   0x9   :  { %v19_v13 = vand.u32 15, %v1976_v9  ;;  %vm1982_vm3 = vcmp.ge.s32.totalorder %v18_v12, 1  ;;  %vm2027_vm8 = vcmp.lt.s32.totalorder %v18_v12, 15  ;;  %v1785_v57 = vld [vmem:[%s2291_s1 + $0x8] sm:$0xf]  ;;  %vm23_vm14 = vcmp.lt.s32.totalorder %v1976_v9, 240 }
   0xa   :  { %43 = vrot.lane.b32.xlu1 %v1936_v3, %s1887_s0  ;;  %41 = vrot.lane.b32.xlu0 %v1926_v1, %s1887_s0  ;;  %vm2009_vm7 = vmand %vm20_vm2, %vm1982_vm3  ;;  %vm609_vm15 = vcmp.lt.s32.totalorder %v1973_v8, 113  ;;  %v1809_v35 = vld [vmem:[%s2291_s1 + $0x20] sm:$0xf]  ;;  %s1731_s5 = sshll.u32 %s1895_s4, 4  ;;  %s1732_s5 = int_to_ptr.vmem [resolvable:$true] %s1731_s5 }
   0xb   :  { %vm2001_vm6 = vcmp.ge.s32.totalorder %v19_v13, 1  ;;  %vm2047_vm10 = vcmp.lt.s32.totalorder %v19_v13, 15  ;;  %vm2055_vm11 = vmand %vm20_vm2, %vm2027_vm8  ;;  %p1866_p1 = scmp.lt.s32.totalorder %s1732_s5, %s1732_s5 }
   0xe   :  { %915 = vrot.lane.b32.xlu1 %v1932_v2, %s1887_s0  ;;  %913 = vrot.lane.b32.xlu0 %v1921_v0, %s1887_s0 }
  0x12   :  { %234 = vrot.lane.b32.xlu1 %v1936_v3, %s1888_s17  ;;  %232 = vrot.lane.b32.xlu0 %v1926_v1, %s1888_s17 }
  0x16   :  { %1093 = vrot.lane.b32.xlu1 %v1932_v2, %s1888_s17  ;;  %1091 = vrot.lane.b32.xlu0 %v1921_v0, %s1888_s17 }
  0x1a   :  { %331 = vrot.lane.b32.xlu1 %v1936_v3, %s1889_s18  ;;  %329 = vrot.lane.b32.xlu0 %v1926_v1, %s1889_s18 }
  0x1e   :  { %1184 = vrot.lane.b32.xlu1 %v1932_v2, %s1889_s18  ;;  %1182 = vrot.lane.b32.xlu0 %v1921_v0, %s1889_s18 }
  0x22   :  { %510 = vrot.lane.b32.xlu1 %v1936_v3, %s1890_s19  ;;  %508 = vrot.lane.b32.xlu0 %v1926_v1, %s1890_s19 }
  0x26   :  { %1356 = vrot.lane.b32.xlu1 %v1932_v2, %s1890_s19  ;;  %1354 = vrot.lane.b32.xlu0 %v1921_v0, %s1890_s19 }
  0x2a   :  { %607 = vrot.lane.b32.xlu1 %v1936_v3, %s1891_s20  ;;  %605 = vrot.lane.b32.xlu0 %v1926_v1, %s1891_s20 }
  0x2e   :  { %1447 = vrot.lane.b32.xlu1 %v1932_v2, %s1891_s20  ;;  %1445 = vrot.lane.b32.xlu0 %v1921_v0, %s1891_s20 }
  0x32   :  { %704 = vrot.lane.b32.xlu1 %v1936_v3, %s1892_s21  ;;  %702 = vrot.lane.b32.xlu0 %v1926_v1, %s1892_s21 }
  0x36   :  { %1538 = vrot.lane.b32.xlu1 %v1932_v2, %s1892_s21  ;;  %1536 = vrot.lane.b32.xlu0 %v1921_v0, %s1892_s21 }
  0x3a   :  { %801 = vrot.lane.b32.xlu1 %v1936_v3, %s1893_s22  ;;  %799 = vrot.lane.b32.xlu0 %v1926_v1, %s1893_s22 }
  0x3e   :  { %1629 = vrot.lane.b32.xlu1 %v1932_v2, %s1893_s22  ;;  %1627 = vrot.lane.b32.xlu0 %v1921_v0, %s1893_s22 }
  0x42   :  { %898 = vperm.xlu0 %1858, %v36_v6  }
  0x74   :  { %v923_v10 = vpop.permute.xlu1 %922  ;;  %v56_v11 = vpop.permute.xlu0 %55 }
  0x78   :  { %v925_v14 = vpop.permute.xlu1 %924  ;;  %v58_v15 = vpop.permute.xlu0 %57 }
  0x79   :  { %v927_v17 = vsel %vm59_vm0, %v925_v14, %v923_v10  ;;  %v61_v18 = vsel %vm59_vm0, %v58_v15, %v56_v11  ;;  %v60_v19 = vsel %vm59_vm0, %v56_v11, %v58_v15  ;;  %v926_v20 = vsel %vm59_vm0, %v923_v10, %v925_v14  ;;  %v1753_v11 = vld [vmem:[%s2291_s1 + $0xc] sm:$0xf]  ;;  %vm2163_vm0 = vmand %vm23_vm14, %vm2001_vm6 }
  0x7a   :  { %1743 = vmatprep.subr.msk.mxu0 %vm74_vm1, %v60_v19  ;;  %1779 = vmatprep.subr.msk.mxu1 %vm74_vm1, %v926_v20  ;;  %v66_v23 = vsel %vm20_vm2, %v61_v18, 0.0  ;;  %v928_v24 = vsel %vm20_vm2, %v927_v17, 0.0  ;;  %v1789_v14 = vld [vmem:[%s2291_s1 + $0xc] sm:$0xf]  ;;  %vm706_vm2 = vcmp.lt.s32.totalorder %v1973_v8, 112 }
  0x7b   :  { %1744 = vmatpush1.msk.msra.mxu0 %vm74_vm1, %v66_v23  ;;  %1780 = vmatpush1.msk.msra.mxu1 %vm74_vm1, %v928_v24  ;;  %v1793_v23 = vld [vmem:[%s2291_s1 + $0x10] sm:$0xf] }
  0x7c   :  { %v44_v27 = vpop.permute.xlu1 %43  ;;  %v42_v28 = vpop.permute.xlu0 %41  ;;  %1745 = vmatmul.mubr.msk.f32.vlgmr.msra.gmra.mrb[0].mxu0 %vm70_vm4, %v1742_v21  ;;  %1781 = vmatmul.mubr.msk.f32.vlgmr.msra.gmra.mrb[0].mxu1 %vm70_vm4, %v1778_v22 }
  0x7d   :  { %v46_v29 = vsel %vm45_vm5, %v42_v28, %v44_v27  ;;  %v47_v30 = vsel %vm45_vm5, %v44_v27, %v42_v28  ;;  %225 = vmatprep.mubr.f32.mxu0 %v1886_v4  ;;  %1084 = vmatprep.mubr.f32.mxu1 %v1886_v4 }
  0x7e   :  { %v52_v31 = vsel %vm2009_vm7, %v47_v30, 0.0  ;;  %v53_v32 = vsel %vm2001_vm6, %v46_v29, 0.0 }
  0x7f   :  { %1746 = vmatprep.subr.msk.mxu0 %vm74_vm1, %v53_v32 }
  0x80   :  { %v916_v33 = vpop.permute.xlu1 %915  ;;  %v914_v34 = vpop.permute.xlu0 %913  ;;  %1747 = vmatpush1.msk.msra.mxu0 %vm74_vm1, %v52_v31 }
  0x81   :  { %v917_v36 = vsel %vm45_vm5, %v914_v34, %v916_v33  ;;  %v918_v37 = vsel %vm45_vm5, %v916_v33, %v914_v34  ;;  %v1761_v34 = vld [vmem:[%s2291_s1 + $0x14] sm:$0xf]  ;;  %vm2230_vm5 = vmand %vm23_vm14, %vm2047_vm10 }
  0x82   :  { %v919_v39 = vsel %vm2009_vm7, %v918_v37, 0.0  ;;  %v920_v40 = vsel %vm2001_vm6, %v917_v36, 0.0 }
  0x83   :  { %1782 = vmatprep.subr.msk.mxu1 %vm74_vm1, %v920_v40 }
  0x84   :  { %v235_v44 = vpop.permute.xlu1 %234  ;;  %v233_v45 = vpop.permute.xlu0 %232  ;;  %1748 = vmatmul.mubr.msk.f32.vlgmr.msra.gmra.mrb[0].mxu0 %vm70_vm4, %v54_v38  ;;  %1783 = vmatpush1.msk.msra.mxu1 %vm74_vm1, %v919_v39  ;;  %v1797_v39 = vld [vmem:[%s2291_s1 + $0x14] sm:$0xf] }
  0x85   :  { %v237_v46 = vsel %vm236_vm9, %v233_v45, %v235_v44  ;;  %v238_v47 = vsel %vm236_vm9, %v235_v44, %v233_v45  ;;  %1784 = vmatmul.mubr.msk.f32.vlgmr.msra.gmra.mrb[0].mxu1 %vm70_vm4, %v921_v41  ;;  %320 = vmatprep.mubr.f32.mxu0 %v1886_v4 }
  0x86   :  { %v243_v48 = vsel %vm2055_vm11, %v238_v47, 0.0  ;;  %v244_v49 = vsel %vm2047_vm10, %v237_v46, 0.0  ;;  %1173 = vmatprep.mubr.f32.mxu1 %v1886_v4 }
  0x87   :  { %1750 = vmatprep.subr.msk.mxu0 %vm74_vm1, %v244_v49 }
  0x88   :  { %v1094_v50 = vpop.permute.xlu1 %1093  ;;  %v1092_v51 = vpop.permute.xlu0 %1091  ;;  %1751 = vmatpush1.msk.msra.mxu0 %vm74_vm1, %v243_v48  ;;  %v1765_v48 = vld [vmem:[%s2291_s1 + $0x18] sm:$0xf] }
  0x89   :  { %v1095_v52 = vsel %vm236_vm9, %v1092_v51, %v1094_v50  ;;  %v1096_v53 = vsel %vm236_vm9, %v1094_v50, %v1092_v51  ;;  %v1801_v51 = vld [vmem:[%s2291_s1 + $0x18] sm:$0xf] }
  0x8a   :  { %v1097_v55 = vsel %vm2055_vm11, %v1096_v53, 0.0  ;;  %v1098_v56 = vsel %vm2047_vm10, %v1095_v52, 0.0 }
  0x8b   :  { %1786 = vmatprep.subr.msk.mxu1 %vm74_vm1, %v1098_v56 }
  0x8c   :  { %v332_v58 = vpop.permute.xlu1 %331  ;;  %v330_v59 = vpop.permute.xlu0 %329  ;;  %1752 = vmatmul.mubr.msk.f32.vlgmr.msra.gmra.mrb[0].mxu0 %vm70_vm4, %v1749_v54  ;;  %1787 = vmatpush1.msk.msra.mxu1 %vm74_vm1, %v1097_v55 }
  0x8d   :  { %v334_v60 = vsel %vm333_vm12, %v330_v59, %v332_v58  ;;  %v335_v61 = vsel %vm333_vm12, %v332_v58, %v330_v59  ;;  %1788 = vmatmul.mubr.msk.f32.vlgmr.msra.gmra.mrb[0].mxu1 %vm70_vm4, %v1785_v57  ;;  %417 = vmatprep.mubr.f32.mxu0 %v1886_v4 }
  0x8e   :  { %v340_v62 = vsel %vm1982_vm3, %v335_v61, 0.0  ;;  %v341_v63 = vsel %vm2001_vm6, %v334_v60, 0.0  ;;  %1264 = vmatprep.mubr.f32.mxu1 %v1886_v4  ;;  %v1769_v60 = vld [vmem:[%s2291_s1 + $0x1c] sm:$0xf] }
  0x8f   :  { %1754 = vmatprep.subr.msk.mxu0 %vm74_vm1, %v341_v63 }
  0x90   :  { %v1185_v5 = vpop.permute.xlu1 %1184  ;;  %v1183_v6 = vpop.permute.xlu0 %1182  ;;  %1755 = vmatpush1.msk.msra.mxu0 %vm74_vm1, %v340_v62 }
  0x91   :  { %v1186_v7 = vsel %vm333_vm12, %v1183_v6, %v1185_v5  ;;  %v1187_v10 = vsel %vm333_vm12, %v1185_v5, %v1183_v6  ;;  %1758 = vmatprep.subr.msk.mxu0 %vm74_vm1, %v1936_v3  ;;  %v1805_v5 = vld [vmem:[%s2291_s1 + $0x1c] sm:$0xf] }
  0x92   :  { %v1188_v12 = vsel %vm1982_vm3, %v1187_v10, 0.0  ;;  %v1189_v13 = vsel %vm2001_vm6, %v1186_v7, 0.0 }
  0x93   :  { %1790 = vmatprep.subr.msk.mxu1 %vm74_vm1, %v1189_v13 }
  0x94   :  { %1756 = vmatmul.mubr.msk.f32.vlgmr.msra.gmra.mrb[0].mxu0 %vm70_vm4, %v1753_v11  ;;  %1791 = vmatpush1.msk.msra.mxu1 %vm74_vm1, %v1188_v12  ;;  %v511_v15 = vpop.permute.xlu1 %510  ;;  %v509_v3 = vpop.permute.xlu0 %508 }
  0x95   :  { %1792 = vmatmul.mubr.msk.f32.vlgmr.msra.gmra.mrb[0].mxu1 %vm70_vm4, %v1789_v14  ;;  %v514_v17 = vsel %vm512_vm13, %v511_v15, %v509_v3  ;;  %1759 = vmatpush1.msk.msra.mxu0 %vm74_vm1, %v1926_v1  ;;  %v513_v19 = vsel %vm512_vm13, %v509_v3, %v511_v15  ;;  %v1757_v1 = vld [vmem:[%s2291_s1 + $0x10] sm:$0xf] }
  0x96   :  { %v520_v18 = vsel %vm2047_vm10, %v514_v17, 0.0  ;;  %499 = vmatprep.mubr.f32.mxu0 %v1886_v4  ;;  %1794 = vmatprep.subr.msk.mxu1 %vm74_vm1, %v1932_v2 }
  0x97   :  { %1795 = vmatpush1.msk.msra.mxu1 %vm74_vm1, %v1921_v0  ;;  %1345 = vmatprep.mubr.f32.mxu1 %v1886_v4  ;;  %v519_v0 = vsel %vm2027_vm8, %v513_v19, 0.0 }
  0x98   :  { %v1357_v20 = vpop.permute.xlu1 %1356  ;;  %v1355_v21 = vpop.permute.xlu0 %1354  ;;  %1762 = vmatprep.subr.msk.mxu0 %vm74_vm1, %v520_v18 }
  0x99   :  { %v1358_v2 = vsel %vm512_vm13, %v1355_v21, %v1357_v20  ;;  %v1359_v22 = vsel %vm512_vm13, %v1357_v20, %v1355_v21 }
  0x9a   :  { %v1361_v24 = vsel %vm2047_vm10, %v1359_v22, 0.0  ;;  %v1360_v26 = vsel %vm2027_vm8, %v1358_v2, 0.0 }
  0x9b   :  { %1798 = vmatprep.subr.msk.mxu1 %vm74_vm1, %v1361_v24 }
  0x9c   :  { %1760 = vmatmul.mubr.msk.f32.vlgmr.msra.gmra.mrb[0].mxu0 %vm70_vm4, %v1757_v1  ;;  %v608_v28 = vpop.permute.xlu1 %607  ;;  %v606_v29 = vpop.permute.xlu0 %605 }
  0x9d   :  { %1796 = vmatmul.mubr.msk.f32.vlgmr.msra.gmra.mrb[0].mxu1 %vm70_vm4, %v1793_v23  ;;  %1763 = vmatpush1.msk.msra.mxu0 %vm74_vm1, %v519_v0  ;;  %v611_v30 = vsel %vm609_vm15, %v608_v28, %v606_v29  ;;  %v610_v31 = vsel %vm609_vm15, %v606_v29, %v608_v28 }
  0x9e   :  { %v617_v25 = vsel %vm2163_vm0, %v611_v30, 0.0  ;;  %596 = vmatprep.mubr.f32.mxu0 %v1886_v4  ;;  %1799 = vmatpush1.msk.msra.mxu1 %vm74_vm1, %v1360_v26  ;;  %v616_v38 = vsel %vm1982_vm3, %v610_v31, 0.0 }
  0x9f   :  { %1436 = vmatprep.mubr.f32.mxu1 %v1886_v4  ;;  %1766 = vmatprep.subr.msk.mxu0 %vm74_vm1, %v617_v25 }
  0xa0   :  { %v1448_v32 = vpop.permute.xlu1 %1447  ;;  %v1446_v33 = vpop.permute.xlu0 %1445 }
  0xa1   :  { %v1449_v36 = vsel %vm609_vm15, %v1446_v33, %v1448_v32  ;;  %v1450_v37 = vsel %vm609_vm15, %v1448_v32, %v1446_v33 }
  0xa2   :  { %v1452_v40 = vsel %vm2163_vm0, %v1450_v37, 0.0  ;;  %v1451_v41 = vsel %vm1982_vm3, %v1449_v36, 0.0  ;;  %vm803_vm3 = vcmp.lt.s32.totalorder %v1973_v8, 111  ;;  %v1773_v8 = vld [vmem:[%s2291_s1 + $0x20] sm:$0xf]  ;;  %s1861_s1 = scalar_lea.vmem %s1732_s5, 256 }
  0xa3   :  { %1802 = vmatprep.subr.msk.mxu1 %vm74_vm1, %v1452_v40  ;;  %p1862_p0 = scmp.ne.s32.totalorder %s1732_s5, %s1861_s1  ;;  %p1867_p2 = scmp.lt.s32.totalorder %s1861_s1, %s1861_s1 }
  0xa4   :  { %1764 = vmatmul.mubr.msk.f32.vlgmr.msra.gmra.mrb[0].mxu0 %vm70_vm4, %v1761_v34  ;;  %v705_v43 = vpop.permute.xlu1 %704  ;;  %v703_v44 = vpop.permute.xlu0 %702 }
  0xa5   :  { %1800 = vmatmul.mubr.msk.f32.vlgmr.msra.gmra.mrb[0].mxu1 %vm70_vm4, %v1797_v39  ;;  %1767 = vmatpush1.msk.msra.mxu0 %vm74_vm1, %v616_v38  ;;  %v708_v45 = vsel %vm706_vm2, %v705_v43, %v703_v44  ;;  %v707_v50 = vsel %vm706_vm2, %v703_v44, %v705_v43  ;;  %p1868_p3 = por %p1867_p2, %p1866_p1 }
  0xa6   :  { %v714_v46 = vsel %vm23_vm14, %v708_v45, 0.0  ;;  %693 = vmatprep.mubr.f32.mxu0 %v1886_v4  ;;  %1803 = vmatpush1.msk.msra.mxu1 %vm74_vm1, %v1451_v41 }
  0xa7   :  { %1527 = vmatprep.mubr.f32.mxu1 %v1886_v4  ;;  %1770 = vmatprep.subr.msk.mxu0 %vm74_vm1, %v714_v46  ;;  %p1869_p4 = pnand %p1868_p3, %p1862_p0 }
  0xa8   :  { %v1539_v16 = vpop.permute.xlu1 %1538  ;;  %v1537_v47 = vpop.permute.xlu0 %1536 }
  0xa9   :  { %v1541_v49 = vsel %vm706_vm2, %v1539_v16, %v1537_v47  ;;  %v1540_v53 = vsel %vm706_vm2, %v1537_v47, %v1539_v16 }
  0xaa   :  { %v1543_v52 = vsel %vm23_vm14, %v1541_v49, 0.0 }
  0xab   :  { %1806 = vmatprep.subr.msk.mxu1 %vm74_vm1, %v1543_v52 }
  0xac   :  { %1768 = vmatmul.mubr.msk.f32.vlgmr.msra.gmra.mrb[0].mxu0 %vm70_vm4, %v1765_v48  ;;  %v802_v55 = vpop.permute.xlu1 %801  ;;  %v800_v56 = vpop.permute.xlu0 %799 }
  0xad   :  { %1804 = vmatmul.mubr.msk.f32.vlgmr.msra.gmra.mrb[0].mxu1 %vm70_vm4, %v1801_v51  ;;  %1771 = vmatpush1.msk.msra.mxu0 %vm74_vm1, %v707_v50  ;;  %v805_v57 = vsel %vm803_vm3, %v802_v55, %v800_v56  ;;  %v804_v42 = vsel %vm803_vm3, %v800_v56, %v802_v55 }
  0xae   :  { %1807 = vmatpush1.msk.msra.mxu1 %vm74_vm1, %v1540_v53  ;;  %v811_v9 = vsel %vm2230_vm5, %v805_v57, 0.0  ;;  %790 = vmatprep.mubr.f32.mxu0 %v1886_v4  ;;  %v810_v63 = vsel %vm2027_vm8, %v804_v42, 0.0 }
  0xaf   :  { %1618 = vmatprep.mubr.f32.mxu1 %v1886_v4  ;;  %1774 = vmatprep.subr.msk.mxu0 %vm74_vm1, %v811_v9 }
  0xb0   :  { %v1630_v58 = vpop.permute.xlu1 %1629  ;;  %v1628_v59 = vpop.permute.xlu0 %1627 }
  0xb1   :  { %v1631_v61 = vsel %vm803_vm3, %v1628_v59, %v1630_v58  ;;  %v1632_v62 = vsel %vm803_vm3, %v1630_v58, %v1628_v59 }
  0xb2   :  { %v1634_v6 = vsel %vm2230_vm5, %v1632_v62, 0.0  ;;  %v1633_v7 = vsel %vm2027_vm8, %v1631_v61, 0.0 }
  0xb3   :  { %1810 = vmatprep.subr.msk.mxu1 %vm74_vm1, %v1634_v6 }
  0xb4   :  { %1772 = vmatmul.mubr.msk.f32.vlgmr.msra.gmra.mrb[0].mxu0 %vm70_vm4, %v1769_v60 }
  0xb5   :  { %1808 = vmatmul.mubr.msk.f32.vlgmr.msra.gmra.mrb[0].mxu1 %vm70_vm4, %v1805_v5  ;;  %1775 = vmatpush1.msk.msra.mxu0 %vm74_vm1, %v810_v63 }
  0xb6   :  { %887 = vmatprep.mubr.f32.mxu0 %v1886_v4  ;;  %1811 = vmatpush1.msk.msra.mxu1 %vm74_vm1, %v1633_v7 }
  0xb7   :  { %1709 = vmatprep.mubr.f32.mxu1 %v1886_v4 }
  0xbc   :  { %1776 = vmatmul.mubr.msk.f32.vlgmr.msra.gmra.mrb[0].mxu0 %vm70_vm4, %v1773_v8 }
  0xbd   :  { %1812 = vmatmul.mubr.msk.f32.vlgmr.msra.gmra.mrb[0].mxu1 %vm70_vm4, %v1809_v35 }
  0xc1   :  { %v899_v10 = vpop.permute.xlu0 %898 }
 0x18f   :  { %v889_v11 = vpop.f32.mrb[0].mxu0 }
 0x190   :  { %v901_v12 = vadd.f32 %v899_v10, %v889_v11  ;;  %v891_v13 = vpop.f32.mrb[1].mxu0  ;;  %v1711_v14 = vpop.f32.mrb[0].mxu1 }
 0x191   :  { %v902_v4 = vadd.f32 %v899_v10, %v891_v13  ;;  %v1718_v15 = vadd.f32 %v1711_v14, %v899_v10  ;;  %v1713_v3 = vpop.f32.mrb[1].mxu1 }
 0x192   :  { %v1719_v17 = vadd.f32 %v1713_v3, %v899_v10 }
 0x193   :  { %v905_v18 = vcombine.low %v901_v12, %v902_v4 }
 0x194   :  { %v1722_v19 = vcombine.low %v1718_v15, %v1719_v17 }
 0x195   :  { %907 = vst [vmem:[#allocation2] sm:$0xff] %v905_v18 }
 0x196   :  { %1725 = vst [vmem:[#allocation2 + $0x8] sm:$0xff] %v1722_v19 }
 0x197   :  { %1872 = shalt.err (!%p1869_p4)
}
 0x198   :  { %s1873_s8 = scalar_lea.hbm %s2293_s3, 256 }
 0x199   :  { %p1874_p5 = scmp.ne.s32.totalorder %s2293_s3, %s1873_s8  ;;  %p1877_p6 = scmp.lt.u32.totalorder %s1873_s8, %s2293_s3 }
 0x19b   :  { %p1879_p7 = pnand %p1877_p6, %p1874_p5 }
 0x19d   :  { %1882 = shalt.err (!%p1879_p7)
}
 0x19e   :  { %s1896_s13 = smov 128   ;;  %s1897_s14 = smov 8  }
 0x19f   :  { %1737 = dma.vmem_to_hbm [thread:$0]  %s1732_s5, 256, %s2293_s3, [#allocation3], %s1896_s13, %s1896_s13, %s1897_s14  }
 0x1a0   :  { %1883 = dma.done.wait [#allocation3], 256  }
 0x1a1   :  { %1884 = vsyncadd [#allocation3], 4294967040 }
 0x1a2   :  { %1741 = vsyncpa [#allocation3], 1 }

</bundles_post_ra>
